<compile_context>
chip_gen: v6e
topology: v6e:2x2x1
jax: 0.10.0
libtpu: 0.0.40
codegen_flags: <defaults>
</compile_context>

<pallas_src>
import functools

import jax
import jax.numpy as jnp
from jax.experimental import pallas as pl
from jax.experimental.pallas import tpu as pltpu

GAMMA = 2.0  # FocalLoss(gamma=2); constant, folded into an explicit square below.


def _round_up(x, m):
    return ((x + m - 1) // m) * m


def _focal_loss_kernel(logits_ref, target_ref, out_ref, acc_ref,
                       *, n_valid, block_n, tiles_per_split, need_mask):
    i = pl.program_id(1)

    @pl.when(i == 0)
    def _init():
        acc_ref[...] = jnp.zeros_like(acc_ref)

    x = logits_ref[...].astype(jnp.float32)            # (block_n, C)
    t = target_ref[...]                                # (block_n, 1) int32
    bn, c = x.shape

    # Numerically-stable log-softmax pieces (no full logp tensor).
    m = jnp.max(x, axis=-1, keepdims=True)             # (bn, 1)
    z = x - m                                          # (bn, C)
    lse = jnp.log(jnp.sum(jnp.exp(z), axis=-1, keepdims=True))  # (bn, 1)

    # Gather z at the target class via a one-hot compare (no dynamic gather on TPU).
    col = jax.lax.broadcasted_iota(jnp.int32, (bn, c), 1)
    onehot = (col == t).astype(jnp.float32)
    z_t = jnp.sum(z * onehot, axis=-1, keepdims=True)  # (bn, 1)

    logpt = z_t - lse                                  # log p_t
    pt = jnp.exp(logpt)
    one_minus_pt = 1.0 - pt
    loss = -(one_minus_pt * one_minus_pt) * logpt      # gamma == 2 -> single VPU mul

    if need_mask:
        # Zero contributions from rows added by batch padding.
        row = jax.lax.broadcasted_iota(jnp.int32, (bn, 1), 0)
        g = (pl.program_id(0) * tiles_per_split + i) * block_n + row
        loss = jnp.where(g < n_valid, loss, 0.0)

    acc_ref[...] += jnp.sum(loss, axis=0, keepdims=True)   # (1, 1) running sum

    @pl.when(i == tiles_per_split - 1)
    def _finalize():
        out_ref[0] = acc_ref[...] * (1.0 / float(n_valid))  # partial mean for this split


def focal_loss_pallas(logits, target, *, block_n_max=2048, num_splits=2):
    """logits: (N, C) float (f32 or bf16); target: (N,) int -> scalar float32 focal loss."""
    n, c = logits.shape
    target2d = target.astype(jnp.int32).reshape(n, 1)

    # Batch tile size: big enough to amortize per-step grid overhead, small enough
    # to keep double-buffered VMEM use well under the scoped limits on all chips.
    c_lanes = _round_up(max(c, 1), 128)                  # VMEM lane padding of logits
    bytes_per_row = (c_lanes + 128) * 4                  # logits + lane-padded int32 target
    vmem_rows = max(8, ((6 * 1024 * 1024) // bytes_per_row) // 8 * 8)
    block_n = min(block_n_max, vmem_rows, _round_up(pl.cdiv(n, num_splits), 8))
    block_n = max(block_n, 8)

    tiles_per_split = pl.cdiv(n, num_splits * block_n)
    n_pad = num_splits * tiles_per_split * block_n
    if n_pad != n:
        logits = jnp.pad(logits, ((0, n_pad - n), (0, 0)))
        target2d = jnp.pad(target2d, ((0, n_pad - n), (0, 0)))

    kernel = functools.partial(
        _focal_loss_kernel,
        n_valid=n,
        block_n=block_n,
        tiles_per_split=tiles_per_split,
        need_mask=(n_pad != n),
    )

    partials = pl.pallas_call(
        kernel,
        out_shape=jax.ShapeDtypeStruct((num_splits, 1, 1), jnp.float32),
        grid=(num_splits, tiles_per_split),
        in_specs=[
            pl.BlockSpec((block_n, c), lambda s, i: (s * tiles_per_split + i, 0)),
            pl.BlockSpec((block_n, 1), lambda s, i: (s * tiles_per_split + i, 0)),
        ],
        out_specs=pl.BlockSpec((1, 1, 1), lambda s, i: (s, 0, 0)),
        scratch_shapes=[pltpu.VMEM((1, 1), jnp.float32)],
        compiler_params=pltpu.CompilerParams(
            dimension_semantics=("parallel", "arbitrary")),
    )(logits, target2d)

    # Each split already divided its sum by N; adding the partials gives the mean.
    return jnp.sum(partials)


class RecallScore:
    """JAX/Pallas port of trainer/kaggle_bengali/loss.py::RecallScore."""

    def __init__(self, classes_weights):
        # Stored but unused in forward, same as the PyTorch module.
        self.class_weights = jnp.asarray(classes_weights, dtype=jnp.float32)
        self.classes_labels = list(range(len(classes_weights)))

    def __call__(self, output, target):
        return focal_loss_pallas(output, target)


def _reference(logits, target):
    logp = jax.nn.log_softmax(logits.astype(jnp.float32), axis=-1)
    logpt = logp[jnp.arange(logits.shape[0]), target]
    pt = jnp.exp(logpt)
    return jnp.mean(-((1.0 - pt) ** GAMMA) * logpt)


if __name__ == "__main__":
    key = jax.random.PRNGKey(0)
    k1, k2, k3, k4 = jax.random.split(key, 4)

    # Small case (matches the module's (N, C) logits / (N,) int targets).
    N, C = 8, 16
    logits = jax.random.normal(k1, (N, C), dtype=jnp.float32)
    target = jax.random.randint(k2, (N,), 0, C, dtype=jnp.int32)

    module = RecallScore([1.0 / C] * C)
    loss = module(logits, target)
    jax.block_until_ready(loss)
    assert jnp.allclose(loss, _reference(logits, target), atol=1e-5, rtol=1e-5)

    # Slightly larger case to exercise multi-tile accumulation + row-padding mask.
    N2, C2 = 300, 16
    logits2 = jax.random.normal(k3, (N2, C2), dtype=jnp.float32)
    target2 = jax.random.randint(k4, (N2,), 0, C2, dtype=jnp.int32)
    loss2 = module(logits2, target2)
    jax.block_until_ready(loss2)
    assert jnp.allclose(loss2, _reference(logits2, target2), atol=1e-5, rtol=1e-5)

    print("KERNEL_OK")
</pallas_src>

<mosaic_0001>
module attributes {stable_mosaic.version = 11 : i64} {
  func.func @_focal_loss_kernel(%arg0: i32, %arg1: i32, %arg2: memref<8x16xf32, #tpu.memory_space<vmem>>, %arg3: memref<8x1xi32, #tpu.memory_space<vmem>>, %arg4: memref<1x1x1xf32, #tpu.memory_space<vmem>>, %arg5: memref<1x1xf32, #tpu.memory_space<vmem>>) attributes {dimension_semantics = [#tpu.dimension_semantics<parallel>, #tpu.dimension_semantics<arbitrary>], iteration_bounds = array<i64: 2, 1>, scalar_prefetch = 0 : i64, scratch_operands = 1 : i64, tpu.core_type = #tpu.core_type<tc>, window_params = [{transform_indices = @transform_0, window_bounds = array<i64: 8, 16>}, {transform_indices = @transform_1, window_bounds = array<i64: 8, 1>}, {transform_indices = @transform_2, window_bounds = array<i64: 1, 1, 1>}]} {
    %c0_i32 = arith.constant 0 : i32
    %0 = arith.cmpi eq, %arg1, %c0_i32 : i32
    %1 = arith.extui %0 : i1 to i32
    %c0_i32_0 = arith.constant 0 : i32
    %2 = arith.cmpi ne, %1, %c0_i32_0 : i32
    scf.if %2 {
      %cst_17 = arith.constant 0.000000e+00 : f32
      %47 = vector.broadcast %cst_17 : f32 to vector<1x1xf32>
      %c0_18 = arith.constant 0 : index
      %c0_19 = arith.constant 0 : index
      %48 = vector.load %arg5[%c0_18, %c0_19] : memref<1x1xf32, #tpu.memory_space<vmem>>, vector<1x1xf32>
      tpu.vector_store %arg5[%c0_18, %c0_19], %47 {strides = array<i32>} : memref<1x1xf32, #tpu.memory_space<vmem>>, vector<1x1xf32>,
    } else {
    }
    %c0 = arith.constant 0 : index
    %c0_1 = arith.constant 0 : index
    %3 = vector.load %arg2[%c0, %c0_1] : memref<8x16xf32, #tpu.memory_space<vmem>>, vector<8x16xf32>
    %c0_2 = arith.constant 0 : index
    %c0_3 = arith.constant 0 : index
    %4 = vector.load %arg3[%c0_2, %c0_3] : memref<8x1xi32, #tpu.memory_space<vmem>>, vector<8x1xi32>
    %cst = arith.constant dense<0xFF800000> : vector<8xf32>
    %5 = vector.multi_reduction <maximumf>, %3, %cst [1] : vector<8x16xf32> to vector<8xf32>
    %6 = vector.shape_cast %5 : vector<8xf32> to vector<8x1xf32>
    %7 = vector.broadcast %6 : vector<8x1xf32> to vector<8x16xf32>
    %8 = arith.subf %3, %7 : vector<8x16xf32>
    %9 = math.exp %8 : vector<8x16xf32>
    %cst_4 = arith.constant dense<0.000000e+00> : vector<8xf32>
    %10 = vector.multi_reduction <add>, %9, %cst_4 [1] : vector<8x16xf32> to vector<8xf32>
    %11 = vector.shape_cast %10 : vector<8xf32> to vector<8x1xf32>
    %12 = math.log %11 : vector<8x1xf32>
    %13 = tpu.iota {dimensions = array<i32: 1>} : vector<8x16xi32>
    %14 = vector.broadcast %4 : vector<8x1xi32> to vector<8x16xi32>
    %15 = arith.cmpi eq, %13, %14 : vector<8x16xi32>
    %16 = arith.extui %15 : vector<8x16xi1> to vector<8x16xi32>
    %17 = arith.sitofp %16 : vector<8x16xi32> to vector<8x16xf32>
    %18 = arith.mulf %8, %17 : vector<8x16xf32>
    %cst_5 = arith.constant dense<0.000000e+00> : vector<8xf32>
    %19 = vector.multi_reduction <add>, %18, %cst_5 [1] : vector<8x16xf32> to vector<8xf32>
    %20 = vector.shape_cast %19 : vector<8xf32> to vector<8x1xf32>
    %21 = arith.subf %20, %12 : vector<8x1xf32>
    %22 = math.exp %21 : vector<8x1xf32>
    %cst_6 = arith.constant 1.000000e+00 : f32
    %23 = vector.broadcast %cst_6 : f32 to vector<8x1xf32>
    %24 = arith.subf %23, %22 : vector<8x1xf32>
    %25 = arith.mulf %24, %24 : vector<8x1xf32>
    %cst_7 = arith.constant 0.000000e+00 : f32
    %26 = vector.broadcast %cst_7 : f32 to vector<8x1xf32>
    %27 = arith.subf %26, %25 : vector<8x1xf32>
    %28 = arith.mulf %27, %21 : vector<8x1xf32>
    %29 = tpu.iota {dimensions = array<i32: 0>} : vector<8x1xi32>
    %c1_i32 = arith.constant 1 : i32
    %30 = arith.muli %arg0, %c1_i32 : i32
    %31 = arith.addi %30, %arg1 : i32
    %c8_i32 = arith.constant 8 : i32
    %32 = arith.muli %31, %c8_i32 : i32
    %33 = vector.broadcast %32 : i32 to vector<8x1xi32>
    %34 = arith.addi %33, %29 : vector<8x1xi32>
    %c8_i32_8 = arith.constant 8 : i32
    %35 = vector.broadcast %c8_i32_8 : i32 to vector<8x1xi32>
    %36 = arith.cmpi slt, %34, %35 : vector<8x1xi32>
    %cst_9 = arith.constant 0.000000e+00 : f32
    %37 = vector.broadcast %cst_9 : f32 to vector<8x1xf32>
    %38 = arith.select %36, %28, %37 : vector<8x1xi1>, vector<8x1xf32>
    %c0_10 = arith.constant 0 : index
    %c0_11 = arith.constant 0 : index
    %39 = vector.load %arg5[%c0_10, %c0_11] : memref<1x1xf32, #tpu.memory_space<vmem>>, vector<1x1xf32>
    %cst_12 = arith.constant dense<0.000000e+00> : vector<1xf32>
    %40 = vector.multi_reduction <add>, %38, %cst_12 [0] : vector<8x1xf32> to vector<1xf32>
    %41 = vector.shape_cast %40 : vector<1xf32> to vector<1x1xf32>
    %42 = arith.addf %39, %41 : vector<1x1xf32>
    %c0_13 = arith.constant 0 : index
    %c0_14 = arith.constant 0 : index
    %43 = vector.load %arg5[%c0_13, %c0_14] : memref<1x1xf32, #tpu.memory_space<vmem>>, vector<1x1xf32>
    tpu.vector_store %arg5[%c0_13, %c0_14], %42 {strides = array<i32>} : memref<1x1xf32, #tpu.memory_space<vmem>>, vector<1x1xf32>,
    %c0_i32_15 = arith.constant 0 : i32
    %44 = arith.cmpi eq, %arg1, %c0_i32_15 : i32
    %45 = arith.extui %44 : i1 to i32
    %c0_i32_16 = arith.constant 0 : i32
    %46 = arith.cmpi ne, %45, %c0_i32_16 : i32
    scf.if %46 {
      %c0_17 = arith.constant 0 : index
      %c0_18 = arith.constant 0 : index
      %47 = vector.load %arg5[%c0_17, %c0_18] : memref<1x1xf32, #tpu.memory_space<vmem>>, vector<1x1xf32>
      %cst_19 = arith.constant 1.250000e-01 : f32
      %48 = vector.broadcast %cst_19 : f32 to vector<1x1xf32>
      %49 = arith.mulf %47, %48 : vector<1x1xf32>
      %c0_20 = arith.constant 0 : index
      %c0_21 = arith.constant 0 : index
      %c0_22 = arith.constant 0 : index
      %50 = vector.load %arg4[%c0_20, %c0_21, %c0_22] : memref<1x1x1xf32, #tpu.memory_space<vmem>>, vector<1x1x1xf32>
      %51 = vector.shape_cast %50 : vector<1x1x1xf32> to vector<1x1xf32>
      %52 = vector.shape_cast %49 : vector<1x1xf32> to vector<1x1x1xf32>
      tpu.vector_store %arg4[%c0_20, %c0_21, %c0_22], %52 {strides = array<i32>} : memref<1x1x1xf32, #tpu.memory_space<vmem>>, vector<1x1x1xf32>,
    } else {
    }
    return
  }
  func.func @transform_0(%arg0: i32, %arg1: i32) -> (i32, i32) {
    %c1_i32 = arith.constant 1 : i32
    %0 = arith.muli %arg0, %c1_i32 : i32
    %1 = arith.addi %0, %arg1 : i32
    %c0_i32 = arith.constant 0 : i32
    %c0_i32_0 = arith.constant 0 : i32
    return %1, %c0_i32 : i32, i32
  }
  func.func @transform_1(%arg0: i32, %arg1: i32) -> (i32, i32) {
    %c1_i32 = arith.constant 1 : i32
    %0 = arith.muli %arg0, %c1_i32 : i32
    %1 = arith.addi %0, %arg1 : i32
    %c0_i32 = arith.constant 0 : i32
    %c0_i32_0 = arith.constant 0 : i32
    return %1, %c0_i32 : i32, i32
  }
  func.func @transform_2(%arg0: i32, %arg1: i32) -> (i32, i32, i32) {
    %c0_i32 = arith.constant 0 : i32
    %c0_i32_0 = arith.constant 0 : i32
    %c0_i32_1 = arith.constant 0 : i32
    return %arg0, %c0_i32, %c0_i32_0 : i32, i32, i32
  }
}

</mosaic_0001>

<bundles_post_ra>
// kernel: tpu_custom_call.1
= control target key start
LH: loop header
LB: loop body
LE: loop exit
PB: predicated region body
PF: predicated region fallthrough
CT: control target
= control target key end

     0   :  { %s395_s9 = smov 0   ;;  %s397_s10 = smov 0   ;;  %s446_s0 = inlined_call_operand.vmem [shape: f32[16,16], index: 0, kind: input, shape index: {}]   ;;  %s447_s1 = inlined_call_operand.vmem [shape: s32[16,1], index: 1, kind: input, shape index: {}]   ;;  %s448_s2 = inlined_call_operand.vmem [shape: f32[2,1,1], index: 2, kind: output, shape index: {}]  }
   0x1   :  { %s399_s11 = smov 0  }
   0x2 LB: > { %s24_s12 = sadd.s32 1, %s372_s10  ;;  %p314_p0 = scmp.ge.s32.totalorder %s376_s11, 1  ;;  %s376_s11 = sphi %s399_s11, %s12_s11   ;;  %s372_s10 = sphi %s397_s10, %s450_s10   ;;  %s368_s9 = sphi %s395_s9, %s449_s9  }
   0x3   : > { %p26_p1 = scmp.ge.s32.totalorder %s24_s12, 2  ;;  %p140_p2 = scmp.lt.s32.totalorder %s376_s11, 3 }
   0x5   : > { %s452_s12 = smov (%p26_p1, %s24_s12), 0  ;;  %p141_p3 = pnand %p314_p0, %p140_p2 }
   0x6   : > { %p166_p4 = scmp.lt.s32.totalorder (!%p141_p3), %s368_s9, 1  ;;  %s318_s21 = sshll.u32 (!%p141_p3), %s368_s9, 3 }
   0x7   : > { %144 = sbr.rel (%p141_p3) target bundleno = 381 (0x17d), region = 28 }
   0xc   : > { %v378_v0 = vmov 0   ;;  %s417_s13 = scalar_select %p166_p4, %s368_s9, 1  ;;  %vm188_vm0 = vcmask 130048   ;;  %vm184_vm1 = vcmask 0   ;;  %v379_v3 = vmov 0.0  }
   0xd   : > { %347 = vset.pattern.permute.xlu0 %v378_v0  ;;  %185 = vst.msk [vmem:[#allocation2] sm:$0x1] %vm184_vm1, %v379_v3  ;;  %v200_v8 = vlaneseq  ;;  %v223_v23 = vstv %s318_s21 }
   0xe   : > { %s315_s14 = sshll.u32 %s417_s13, 3  ;;  %s179_s24 = scalar_lea.vmem %s448_s2, %s417_s13 }
   0xf   : > { %s169_s17 = scalar_lea.vmem %s446_s0, %s315_s14  ;;  %s175_s20 = scalar_lea.vmem %s447_s1, %s315_s14  ;;  %v201_v9 = vand.u32 127, %v200_v8  ;;  %v220_v22 = vshrl.u32 %v200_v8, 7 }
  0x10   : > { %v186_v1 = vld [vmem:[%s169_s17] sm:$0xff] }
  0x11   : > { %v189_v2 = vsel %vm188_vm0, %v186_v1, -inf  ;;  %v187_v4 = vld [vmem:[%s175_s20] sm:$0xff]  ;;  %v224_v26 = vadd.s32 %v223_v23, %v220_v22 }
  0x12   : > { %190 = vmax.xlane.f32.xlu0 %v189_v2 }
  0x13   : > { %vm225_vm3 = vcmp.lt.s32.totalorder %v224_v26, 8 }
  0x14   : > { %v227_v36 = vld [vmem:[#allocation2] sm:$0x1] }
  0x28   : > { %203 = vperm.xlu0 %347, %v187_v4  }
  0x9b   : > { %v191_v5 = vpop.xlane.xlu0 %190 }
  0x9c   : > { %v192_v6 = vsub.f32 %v186_v1, %v191_v5 }
  0x9e   : > { %v193_v7 = vmul.f32 1.442695, %v192_v6 }
  0xa0   : > { %348 = vpow2.f32 %v193_v7 }
  0xa3   : > { %v204_v10 = vpop.permute.xlu0 %203 }
  0xa4   : > { %vm205_vm2 = vcmp.eq.s32.totalorder %v201_v9, %v204_v10 }
  0xa5   : > { %v317_v11 = vsel %vm205_vm2, 1.0, %v379_v3 }
  0xa6   : > { %v208_v14 = vmul.f32 %v317_v11, %v192_v6 }
  0xa8   : > { %v209_v15 = vsel %vm188_vm0, %v208_v14, 0.0 }
  0xad   : > { %v349_v12 = vpop.eup %348 }
  0xae   : > { %v195_v13 = vsel %vm188_vm0, %v349_v12, 0.0 }
  0xaf   : > { %196 = vadd.xlane.f32.xlu1 %v195_v13 }
  0xb3   : > { %210 = vadd.xlane.f32.xlu1 %v209_v15 }
 0x138   : > { %v197_v16 = vpop.xlane.xlu1 %196 }
 0x139   : > { %350 = vlog2.f32 %v197_v16 }
 0x13c   : > { %v211_v19 = vpop.xlane.xlu1 %210 }
 0x146   : > { %v351_v17 = vpop.eup %350 }
 0x147   : > { %v199_v18 = vmul.f32 0.6931472, %v351_v17 }
 0x149   : > { %v212_v20 = vsub.f32 %v211_v19, %v199_v18 }
 0x14b   : > { %v213_v21 = vmul.f32 1.442695, %v212_v20 }
 0x14d   : > { %352 = vpow2.f32 %v213_v21 }
 0x15a   : > { %v353_v24 = vpop.eup %352 }
 0x15b   : > { %v215_v25 = vsub.f32 1.0, %v353_v24 }
 0x15d   : > { %v216_v27 = vmul.f32 %v215_v25, %v215_v25 }
 0x15f   : > { %v217_v28 = vsub.f32 0.0, %v216_v27 }
 0x161   : > { %v218_v29 = vmul.f32 %v217_v28, %v212_v20 }
 0x163   : > { %v226_v30 = vsel %vm225_vm3, %v218_v29, 0.0 }
 0x164   : > { %v228_v31 = vrot.slane %v226_v30, 4 }
 0x166   : > { %v229_v32 = vadd.f32 %v228_v31, %v226_v30 }
 0x168   : > { %v230_v33 = vrot.slane %v229_v32, 2 }
 0x16a   : > { %v231_v34 = vadd.f32 %v230_v33, %v229_v32 }
 0x16c   : > { %v232_v35 = vrot.slane %v231_v34, 1 }
 0x16e   : > { %v233_v37 = vadd.f32 %v232_v35, %v231_v34 }
 0x170   : > { %v234_v38 = vadd.f32 %v233_v37, %v227_v36 }
 0x172   : > { %236 = vst.msk [vmem:[#allocation2] sm:$0x1] %vm184_vm1, %v234_v38 }
 0x179   : > { %v240_v39 = vld [vmem:[#allocation2] sm:$0x1] }
 0x17a   : > { %v241_v40 = vmul.f32 0.125, %v240_v39 }
 0x17c   : > { %242 = vst.msk [vmem:[%s179_s24] sm:$0x1] %vm184_vm1, %v241_v40 }
 0x17d PF: > { %s12_s11 = sadd.s32 1, %s376_s11   ;;  %s449_s9 = smov %s372_s10 }
 0x17e   : > { %p9_p5 = scmp.ge.s32.totalorder %s12_s11, 4   ;;  %s450_s10 = smov %s452_s12 }
 0x180   :  { %11 = sbr.rel (!%p9_p5) target bundleno = 2 (0x2), region = 69 }

</bundles_post_ra>
